<compile_context>
chip_gen: v7x
topology: tpu7x:2x2x1
jax: 0.10.0
libtpu: 0.0.40
codegen_flags: <defaults>
</compile_context>

<pallas_src>
import functools

import jax
import jax.numpy as jnp
from jax.experimental import pallas as pl
from jax.experimental.pallas import tpu as pltpu


def _se_kernel(x_ref, w1t_ref, b1_ref, w2_ref, b2_ref, o_ref, *, inv_hw):
    # x_ref block: (Nb, C, HW), lane-dense along HW. Weights passed whole.
    x = x_ref[...]                                                    # native dtype

    # AdaptiveAvgPool2d(1): single lane-axis sum (f32 accumulation) * 1/(H*W).
    pooled = jnp.sum(x, axis=-1, dtype=jnp.float32) * inv_hw          # (Nb, C) f32

    # conv1 (1x1), C -> Cr: VPU broadcast-multiply + reduce over C (M tiny, skip MXU).
    # w1t_ref: (C, Cr), b1_ref: (1, Cr)
    h = jnp.sum(w1t_ref[...][None, :, :] * pooled[:, :, None], axis=1) + b1_ref[...]  # (Nb, Cr)
    h = jnp.maximum(h, 0.0)                                           # ReLU

    # conv2 (1x1), Cr -> C.  w2_ref: (C, Cr), b2_ref: (1, C)
    s = jnp.sum(w2_ref[...][None, :, :] * h[:, None, :], axis=2) + b2_ref[...]        # (Nb, C)

    # Hardsigmoid: relu6(s + 3) / 6
    s = jnp.clip(s + 3.0, 0.0, 6.0) * (1.0 / 6.0)

    # torch.mul(identity, scale): broadcast (Nb, C, 1) over (Nb, C, HW) in native dtype.
    o_ref[...] = (x * s.astype(x.dtype)[:, :, None]).astype(o_ref.dtype)


def _choose_batch_tile(n, bytes_per_image, target_bytes):
    """Largest divisor of n with block <= target_bytes, keeping grid >= 2 when n >= 2."""
    best = 1
    for nb in range(1, n + 1):
        if n % nb:
            continue
        if nb > 1 and nb * bytes_per_image > target_bytes:
            break
        if n >= 2 and n // nb < 2:
            break
        best = nb
    return best


def se_module(x, w1, b1, w2, b2, *, target_block_bytes=2 << 20):
    """x: (N, C, H, W); w1: (Cr, C); b1: (Cr,); w2: (C, Cr); b2: (C,)."""
    N, C, H, W = x.shape
    Cr = w1.shape[0]
    HW = H * W

    x2 = x.reshape(N, C, HW)            # lane-dense last dim
    w1t = jnp.transpose(w1)             # (C, Cr)
    b1r = b1.reshape(1, Cr)
    b2r = b2.reshape(1, C)

    bytes_per_image = C * HW * x.dtype.itemsize
    Nb = _choose_batch_tile(N, bytes_per_image, target_block_bytes)
    grid = (N // Nb,)

    kernel = functools.partial(_se_kernel, inv_hw=1.0 / float(HW))

    out = pl.pallas_call(
        kernel,
        out_shape=jax.ShapeDtypeStruct((N, C, HW), x.dtype),
        grid=grid,
        in_specs=[
            pl.BlockSpec((Nb, C, HW), lambda n: (n, 0, 0)),
            pl.BlockSpec((C, Cr), lambda n: (0, 0)),
            pl.BlockSpec((1, Cr), lambda n: (0, 0)),
            pl.BlockSpec((C, Cr), lambda n: (0, 0)),
            pl.BlockSpec((1, C), lambda n: (0, 0)),
        ],
        out_specs=pl.BlockSpec((Nb, C, HW), lambda n: (n, 0, 0)),
        compiler_params=pltpu.CompilerParams(
            dimension_semantics=("parallel",),
            vmem_limit_bytes=32 * 1024 * 1024,
        ),
    )(x2, w1t, b1r, w2, b2r)

    return out.reshape(N, C, H, W)


def se_module_ref(x, w1, b1, w2, b2):
    """Plain-JAX reference matching the PyTorch forward."""
    pooled = jnp.mean(x, axis=(2, 3), keepdims=True)                       # (N, C, 1, 1)
    h = jnp.einsum("rc,ncij->nrij", w1, pooled) + b1[None, :, None, None]  # conv1 1x1
    h = jnp.maximum(h, 0.0)
    s = jnp.einsum("cr,nrij->ncij", w2, h) + b2[None, :, None, None]       # conv2 1x1
    s = jnp.clip(s + 3.0, 0.0, 6.0) / 6.0                                  # hardsigmoid
    return x * s


if __name__ == "__main__":
    # Small shapes consistent with SEModule(channel=4, reduction=4)
    N, C, H, W = 2, 4, 16, 16
    reduction = 4
    Cr = C // reduction

    key = jax.random.PRNGKey(0)
    kx, kw1, kb1, kw2, kb2 = jax.random.split(key, 5)

    x = jax.random.normal(kx, (N, C, H, W), dtype=jnp.float32)

    # Deterministic parameter init (mimics Conv2d default uniform(-1/sqrt(fan_in), ...))
    bound1 = 1.0 / (C ** 0.5)
    w1 = jax.random.uniform(kw1, (Cr, C), jnp.float32, -bound1, bound1)   # conv1 weight (1x1 squeezed)
    b1 = jax.random.uniform(kb1, (Cr,), jnp.float32, -bound1, bound1)
    bound2 = 1.0 / (Cr ** 0.5)
    w2 = jax.random.uniform(kw2, (C, Cr), jnp.float32, -bound2, bound2)   # conv2 weight (1x1 squeezed)
    b2 = jax.random.uniform(kb2, (C,), jnp.float32, -bound2, bound2)

    out = se_module(x, w1, b1, w2, b2)
    out = jax.block_until_ready(out)

    ref = se_module_ref(x, w1, b1, w2, b2)
    assert out.shape == (N, C, H, W)
    assert jnp.allclose(out, ref, atol=1e-5, rtol=1e-5), "Pallas output != reference"

    print("KERNEL_OK")
</pallas_src>

<mosaic_0001>
module attributes {stable_mosaic.version = 11 : i64} {
  func.func @_se_kernel(%arg0: i32, %arg1: memref<1x4x256xf32, #tpu.memory_space<vmem>>, %arg2: memref<4x1xf32, #tpu.memory_space<vmem>>, %arg3: memref<1x1xf32, #tpu.memory_space<vmem>>, %arg4: memref<4x1xf32, #tpu.memory_space<vmem>>, %arg5: memref<1x4xf32, #tpu.memory_space<vmem>>, %arg6: memref<1x4x256xf32, #tpu.memory_space<vmem>>) attributes {dimension_semantics = [#tpu.dimension_semantics<parallel>], iteration_bounds = array<i64: 2>, scalar_prefetch = 0 : i64, scratch_operands = 0 : i64, tpu.core_type = #tpu.core_type<tc>, window_params = [{transform_indices = @transform_0, window_bounds = array<i64: 1, 4, 256>}, {pipeline_mode = #tpu.pipeline_mode<synchronous>, transform_indices = @transform_1, window_bounds = array<i64: 4, 1>}, {pipeline_mode = #tpu.pipeline_mode<synchronous>, transform_indices = @transform_2, window_bounds = array<i64: 1, 1>}, {pipeline_mode = #tpu.pipeline_mode<synchronous>, transform_indices = @transform_3, window_bounds = array<i64: 4, 1>}, {pipeline_mode = #tpu.pipeline_mode<synchronous>, transform_indices = @transform_4, window_bounds = array<i64: 1, 4>}, {transform_indices = @transform_5, window_bounds = array<i64: 1, 4, 256>}]} {
    %c0 = arith.constant 0 : index
    %c0_0 = arith.constant 0 : index
    %c0_1 = arith.constant 0 : index
    %0 = vector.load %arg1[%c0, %c0_0, %c0_1] : memref<1x4x256xf32, #tpu.memory_space<vmem>>, vector<1x4x256xf32>
    %cst = arith.constant dense<0.000000e+00> : vector<1x4xf32>
    %1 = vector.multi_reduction <add>, %0, %cst [2] : vector<1x4x256xf32> to vector<1x4xf32>
    %cst_2 = arith.constant 3.906250e-03 : f32
    %2 = vector.broadcast %cst_2 : f32 to vector<1x4xf32>
    %3 = arith.mulf %1, %2 : vector<1x4xf32>
    %c0_3 = arith.constant 0 : index
    %c0_4 = arith.constant 0 : index
    %4 = vector.load %arg2[%c0_3, %c0_4] : memref<4x1xf32, #tpu.memory_space<vmem>>, vector<4x1xf32>
    %5 = vector.shape_cast %4 : vector<4x1xf32> to vector<1x4x1xf32>
    %6 = vector.shape_cast %3 : vector<1x4xf32> to vector<1x4x1xf32>
    %7 = arith.mulf %5, %6 : vector<1x4x1xf32>
    %cst_5 = arith.constant dense<0.000000e+00> : vector<1x1xf32>
    %8 = vector.multi_reduction <add>, %7, %cst_5 [1] : vector<1x4x1xf32> to vector<1x1xf32>
    %c0_6 = arith.constant 0 : index
    %c0_7 = arith.constant 0 : index
    %9 = vector.load %arg3[%c0_6, %c0_7] : memref<1x1xf32, #tpu.memory_space<vmem>>, vector<1x1xf32>
    %10 = arith.addf %8, %9 : vector<1x1xf32>
    %cst_8 = arith.constant 0.000000e+00 : f32
    %11 = vector.broadcast %cst_8 : f32 to vector<1x1xf32>
    %12 = arith.maximumf %10, %11 : vector<1x1xf32>
    %c0_9 = arith.constant 0 : index
    %c0_10 = arith.constant 0 : index
    %13 = vector.load %arg4[%c0_9, %c0_10] : memref<4x1xf32, #tpu.memory_space<vmem>>, vector<4x1xf32>
    %14 = vector.shape_cast %13 : vector<4x1xf32> to vector<1x4x1xf32>
    %15 = vector.shape_cast %12 : vector<1x1xf32> to vector<1x1x1xf32>
    %16 = vector.broadcast %15 : vector<1x1x1xf32> to vector<1x4x1xf32>
    %17 = arith.mulf %14, %16 : vector<1x4x1xf32>
    %cst_11 = arith.constant dense<0.000000e+00> : vector<1x4xf32>
    %18 = vector.multi_reduction <add>, %17, %cst_11 [2] : vector<1x4x1xf32> to vector<1x4xf32>
    %c0_12 = arith.constant 0 : index
    %c0_13 = arith.constant 0 : index
    %19 = vector.load %arg5[%c0_12, %c0_13] : memref<1x4xf32, #tpu.memory_space<vmem>>, vector<1x4xf32>
    %20 = arith.addf %18, %19 : vector<1x4xf32>
    %cst_14 = arith.constant 3.000000e+00 : f32
    %21 = vector.broadcast %cst_14 : f32 to vector<1x4xf32>
    %22 = arith.addf %20, %21 : vector<1x4xf32>
    %cst_15 = arith.constant 0.000000e+00 : f32
    %cst_16 = arith.constant 6.000000e+00 : f32
    %23 = vector.broadcast %cst_15 : f32 to vector<1x4xf32>
    %24 = arith.maximumf %23, %22 : vector<1x4xf32>
    %25 = vector.broadcast %cst_16 : f32 to vector<1x4xf32>
    %26 = arith.minimumf %25, %24 : vector<1x4xf32>
    %cst_17 = arith.constant 0.166666672 : f32
    %27 = vector.broadcast %cst_17 : f32 to vector<1x4xf32>
    %28 = arith.mulf %26, %27 : vector<1x4xf32>
    %29 = vector.shape_cast %28 : vector<1x4xf32> to vector<1x4x1xf32>
    %30 = vector.broadcast %29 : vector<1x4x1xf32> to vector<1x4x256xf32>
    %31 = arith.mulf %0, %30 : vector<1x4x256xf32>
    %c0_18 = arith.constant 0 : index
    %c0_19 = arith.constant 0 : index
    %c0_20 = arith.constant 0 : index
    %32 = vector.load %arg6[%c0_18, %c0_19, %c0_20] : memref<1x4x256xf32, #tpu.memory_space<vmem>>, vector<1x4x256xf32>
    tpu.vector_store %arg6[%c0_18, %c0_19, %c0_20], %31 {strides = array<i32>} : memref<1x4x256xf32, #tpu.memory_space<vmem>>, vector<1x4x256xf32>,
    return
  }
  func.func @transform_0(%arg0: i32) -> (i32, i32, i32) {
    %c0_i32 = arith.constant 0 : i32
    %c0_i32_0 = arith.constant 0 : i32
    %c0_i32_1 = arith.constant 0 : i32
    return %arg0, %c0_i32, %c0_i32_0 : i32, i32, i32
  }
  func.func @transform_1(%arg0: i32) -> (i32, i32) {
    %c0_i32 = arith.constant 0 : i32
    %c0_i32_0 = arith.constant 0 : i32
    %c0_i32_1 = arith.constant 0 : i32
    return %c0_i32, %c0_i32_0 : i32, i32
  }
  func.func @transform_2(%arg0: i32) -> (i32, i32) {
    %c0_i32 = arith.constant 0 : i32
    %c0_i32_0 = arith.constant 0 : i32
    %c0_i32_1 = arith.constant 0 : i32
    return %c0_i32, %c0_i32_0 : i32, i32
  }
  func.func @transform_3(%arg0: i32) -> (i32, i32) {
    %c0_i32 = arith.constant 0 : i32
    %c0_i32_0 = arith.constant 0 : i32
    %c0_i32_1 = arith.constant 0 : i32
    return %c0_i32, %c0_i32_0 : i32, i32
  }
  func.func @transform_4(%arg0: i32) -> (i32, i32) {
    %c0_i32 = arith.constant 0 : i32
    %c0_i32_0 = arith.constant 0 : i32
    %c0_i32_1 = arith.constant 0 : i32
    return %c0_i32, %c0_i32_0 : i32, i32
  }
  func.func @transform_5(%arg0: i32) -> (i32, i32, i32) {
    %c0_i32 = arith.constant 0 : i32
    %c0_i32_0 = arith.constant 0 : i32
    %c0_i32_1 = arith.constant 0 : i32
    return %arg0, %c0_i32, %c0_i32_0 : i32, i32, i32
  }
}

</mosaic_0001>

<bundles_post_ra>
// kernel: tpu_custom_call.1
= control target key start
LH: loop header
LB: loop body
LE: loop exit
PB: predicated region body
PF: predicated region fallthrough
CT: control target
= control target key end

     0   :  { %s765_s0 = inlined_call_operand.hbm [shape: f32[2,4,256], index: 0, kind: input, shape index: {}]   ;;  %s766_s1 = inlined_call_operand.vmem [shape: f32[4,1], index: 1, kind: input, shape index: {}]   ;;  %s767_s2 = inlined_call_operand.<no memory space> [shape: f32[1,1], index: 2, kind: input, shape index: {}]   ;;  %s768_s3 = inlined_call_operand.vmem [shape: f32[4,1], index: 3, kind: input, shape index: {}]   ;;  %s769_s4 = inlined_call_operand.vmem [shape: f32[1,4], index: 4, kind: input, shape index: {}]   ;;  %s770_s5 = inlined_call_operand.hbm [shape: f32[2,4,256], index: 5, kind: output, shape index: {}]  }
   0x1   :  { %v10_v0 = vstv %s767_s2 }
   0x2   :  { %11 = vst [vmem:[#allocation2] sm:$0x1] %v10_v0 }
   0x3   :  { %12 = vsyncpa [#allocation4], 0 }
   0x4   :  { %14 = vsyncpa [#allocation4 + $0x1], 0 }
   0x5   :  { %15 = vsyncpa [#allocation5], 0 }
   0x6   :  { %17 = vsyncpa [#allocation5 + $0x1], 0  ;;  %s591_s20 = smov 0   ;;  %s593_s21 = smov 0  }
   0x7   :  { %s595_s22 = smov 0   ;;  %s597_s23 = smov 0  }
   0x8 LB: > { %s612_s2 = sadd.s32 4294967295, %s552_s23   ;;  %s388_s24 = sadd.s32 4294967294, %s552_s23   ;;  %s552_s23 = sphi %s597_s23, %s785_s23   ;;  %s548_s22 = sphi %s595_s22, %s784_s22   ;;  %s544_s21 = sphi %s593_s21, %s783_s21   ;;  %s540_s20 = sphi %s591_s20, %s782_s20  }
   0x9   : > { %s616_s25 = sadd.s32 1, %s552_s23   ;;  %s30_s26 = sadd.s32 1, %s548_s22 }
   0xa   : > { %s27_s27 = ssub.s32 %s552_s23, %s616_s25  ;;  %p37_p0 = scmp.ne.s32.totalorder %s548_s22, %s544_s21 }
   0xb   : > { %p28_p1 = scmp.eq.s32.totalorder %s27_s27, 0  ;;  %p38_p2 = scmp.eq.s32.totalorder %s552_s23, 0 }
   0xc   : > { %p43_p3 = scmp.ne.s32.totalorder %s544_s21, %s540_s20  ;;  %p44_p4 = scmp.eq.s32.totalorder %s612_s2, 0 }
   0xd   : > { %s628_s28 = scalar_select %p28_p1, %s548_s22, %s30_s26  }
   0xe   : > { %p630_p5 = por %p38_p2, %p37_p0  ;;  %p634_p6 = por %p44_p4, %p43_p3 }
   0xf   : > { %p151_p7 = scmp.eq.s32.totalorder %s612_s2, 1  ;;  %p157_p8 = scmp.eq.s32.totalorder %s388_s24, 1 }
  0x10   : > { %p417_p10 = scmp.lt.s32.totalorder %s552_s23, 2  ;;  %s189_s8 = sand.u32 1, %s548_s22  }
  0x11   : > { %p641_p11 = por %p151_p7, %p37_p0  ;;  %p645_p12 = por %p157_p8, %p43_p3 }
  0x12   : > { %s403_s9 = sshll.u32 %s552_s23, 7  ;;  %s391_s10 = sshll.u32 %s189_s8, 3 }
  0x13   : > { %s774_s6 = scalar_select %p641_p11, 1, 0 }
  0x14   : > { %s775_s7 = scalar_select %p645_p12, 1, 0 }
  0x15   : > { %s654_s13 = scalar_lea.hbm %s765_s0, %s403_s9  ;;  %s193_s14 = scalar_lea.vmem [#allocation3], %s391_s10 }
  0x16   : > { %s201_s15 = sshll.u32 %s193_s14, 4  ;;  %p658_p13 = pnand %p417_p10, %p630_p5  ;;  %s662_s15 = int_to_ptr.vmem [resolvable:$true] %s201_s15 }
  0x17   : > { %s190_s17 = scalar_lea.sflag [#allocation4], %s189_s8  ;;  %s456_s18 = scalar_lea.hbm %s654_s13, 128 }
  0x18   : > { %p457_p2 = scmp.ne.s32.totalorder %s654_s13, %s456_s18  ;;  %p458_p3 = pneg %p658_p13 }
  0x19   : > { %s461_s26 = scalar_lea.hbm %s765_s0, 256  ;;  %p462_p5 = scmp.lt.u32.totalorder %s654_s13, %s765_s0 }
  0x1a   : > { %p459_p4 = pnand %p458_p3, %p457_p2  ;;  %p463_p8 = scmp.lt.u32.totalorder %s461_s26, %s456_s18 }
  0x1b   : > { %p465_p9 = scmp.lt.u32.totalorder %s456_s18, %s654_s13 }
  0x1c   : > { %p460_p7 = pneg %p459_p4  ;;  %p464_p10 = por %p463_p8, %p462_p5 }
  0x1e   : > { %p466_p0 = por %p465_p9, %p464_p10 }
  0x20   : > { %p467_p1 = pnand %p466_p0, %p460_p7 }
  0x22   : > { %470 = shalt.err (!%p467_p1)
}
  0x23   : > { %s471_s8 = scalar_lea.vmem %s662_s15, 128  ;;  %s554_s9 = smov [#allocation3]  }
  0x24   : > { %p472_p2 = scmp.ne.s32.totalorder %s662_s15, %s471_s8  ;;  %s476_s10 = sshll.u32 %s554_s9, 4  ;;  %s477_s10 = int_to_ptr.vmem [resolvable:$false] %s476_s10 }
  0x25   : > { %s478_s11 = scalar_lea.vmem %s477_s10, 256  ;;  %p479_p11 = scmp.lt.s32.totalorder %s662_s15, %s477_s10 }
  0x26   : > { %p474_p4 = pnand %p472_p2, %p458_p3  ;;  %p480_p5 = scmp.lt.s32.totalorder %s478_s11, %s471_s8 }
  0x28   : > { %p475_p12 = pneg %p474_p4  ;;  %p481_p8 = por %p480_p5, %p479_p11 }
  0x2a   : > { %p482_p9 = pnand %p481_p8, %p475_p12 }
  0x2c   : > { %485 = shalt.err (!%p482_p9)
}
  0x2d   : > { %412 = dma.hbm_to_vmem [thread:$0]  (!%p658_p13), %s654_s13, 128, %s662_s15, %s190_s17  }
  0x2e   : > { %p777_p0 = scmp.lt.s32.totalorder %s552_s23, 3  ;;  %p778_p1 = scmp.ge.s32.totalorder %s552_s23, 1 }
  0x30   : > { %p207_p3 = pnand %p778_p1, %p777_p0 }
  0x31   : > { %s696_s12 = sand.u32 (!%p207_p3), 1, %s544_s21  }
  0x32   : > { %210 = sbr.rel (%p207_p3) target bundleno = 387 (0x183), region = 40  ;;  %s395_s14 = sshll.u32 (!%p207_p3), %s696_s12, 3 }
  0x33   : > { %s213_s18 = scalar_lea.sflag (!%p207_p3), [#allocation4], %s696_s12  ;;  %s216_s16 = scalar_lea.vmem (!%p207_p3), [#allocation3], %s395_s14 }
  0x39   : > { %531 = dma.done.wait (%p634_p6), %s213_s18, 128  }
  0x3a   : > { %533 = vsyncadd (%p634_p6), %s213_s18, 4294967168  ;;  %vm247_vm0 = vcmask 1043456   ;;  %v243_v1 = vld [vmem:[%s216_s16] sm:$0xff]  ;;  %v397_v6 = vld [vmem:[%s769_s4] ss:$0 sm:$0xff]  ;;  %v555_v7 = vmov 0   ;;  %v268_v16 = vlaneseq }
  0x3b   : > { %v245_v2 = vcombine.high %v243_v1, %v243_v1  ;;  %v248_v3 = vsel %vm247_vm0, %v243_v1, 0.0  ;;  %453 = vset.pattern.permute.xlu1 %v555_v7  ;;  %454 = vset.pattern.permute.xlu0 %v555_v7  ;;  %v254_v8 = vld [vmem:[%s766_s1] sm:$0xf]  ;;  %vm256_vm1 = vcmask 3072   ;;  %v556_v34 = vmov 839922192  }
  0x3c   : > { %v269_v19 = vshrl.u32 %v268_v16, 7  ;;  %v264_v20 = vld [vmem:[#allocation2] sm:$0x1]  ;;  %v294_v35 = vunpack.c.l.s4 %v556_v34  ;;  %s404_s26 = sshll.u32 %s612_s2, 7  ;;  %s242_s27 = scalar_lea.vmem [#allocation6], %s395_s14 }
  0x3d   : > { %v249_v4 = vsel %vm247_vm0, %v245_v2, 0.0  ;;  %v267_v25 = vld [vmem:[%s768_s3] sm:$0xf]  ;;  %s318_s29 = sshll.u32 %s242_s27, 4  ;;  %s721_s10 = scalar_lea.hbm %s770_s5, %s404_s26  ;;  %s723_s29 = int_to_ptr.vmem [resolvable:$true] %s318_s29 }
  0x3e   : > { %v250_v5 = vadd.f32 %v249_v4, %v248_v3  ;;  %v270_v23 = vsub.s32 0, %v269_v19  ;;  %v295_v36 = vunpack.c.0.s8 %v294_v35  ;;  %s304_s11 = scalar_lea.sflag [#allocation5], %s696_s12  ;;  %s486_s18 = scalar_lea.vmem %s723_s29, 128 }
  0x3f   : > { %p487_p6 = scmp.ne.s32.totalorder %s723_s29, %s486_s18  ;;  %p779_p11 = scmp.ne.s32.totalorder %s774_s6, 0 }
  0x40   : > { %251 = vadd.xlane.f32.xlu0 %v250_v5  ;;  %v298_v37 = vsub.s32 %v295_v36, %v269_v19  ;;  %s557_s2 = smov [#allocation6]  }
  0x41   : > { %p488_p12 = pnand %p487_p6, %p779_p11  ;;  %s490_s14 = sshll.u32 %s557_s2, 4  ;;  %s491_s14 = int_to_ptr.vmem [resolvable:$false] %s490_s14 }
  0x42   : > { %s492_s16 = scalar_lea.vmem %s491_s14, 256  ;;  %p493_p7 = scmp.lt.s32.totalorder %s723_s29, %s491_s14 }
  0x43   : > { %p489_p13 = pneg %p488_p12  ;;  %p494_p10 = scmp.lt.s32.totalorder %s492_s16, %s486_s18 }
  0x45   : > { %p495_p2 = por %p494_p10, %p493_p7 }
  0x47   : > { %p496_p4 = pnand %p495_p2, %p489_p13 }
  0x56   : > { %281 = vbcast.lane.b32.xlu0 %v397_v6, 256 }
  0xcd   : > { %v252_v9 = vpop.xlane.xlu0 %251 }
  0xce   : > { %v253_v10 = vmul.f32 0.00390625, %v252_v9 }
  0xd0   : > { %v255_v11 = vmul.f32 %v254_v8, %v253_v10 }
  0xd1   : > { %v282_v27 = vpop.permute.xlu0 %281 }
  0xd2   : > { %v257_v12 = vsel %vm256_vm1, %v255_v11, 0.0 }
  0xd3   : > { %v258_v13 = vrot.slane %v257_v12, 4 }
  0xd5   : > { %v259_v14 = vadd.f32 %v258_v13, %v257_v12 }
  0xd7   : > { %v260_v15 = vrot.slane %v259_v14, 2 }
  0xd9   : > { %v261_v17 = vadd.f32 %v260_v15, %v259_v14 }
  0xdb   : > { %v262_v18 = vrot.slane %v261_v17, 1 }
  0xdd   : > { %v263_v21 = vadd.f32 %v262_v18, %v261_v17 }
  0xdf   : > { %v265_v22 = vadd.f32 %v264_v20, %v263_v21 }
  0xe1   : > { %v266_v24 = vmax.f32 %v265_v22, 0.0 }
  0xe3   : > { %v271_v26 = vrot.slane %v266_v24, %v270_v23 }
  0xe5   : > { %v272_v28 = vmul.f32 %v271_v26, %v267_v25 }
  0xe7   : > { %v284_v29 = vadd.f32 %v282_v27, %v272_v28 }
  0xe9   : > { %v285_v30 = vadd.f32 3.0, %v284_v29 }
  0xeb   : > { %v286_v31 = vmax.f32 %v285_v30, 0.0 }
  0xed   : > { %v287_v32 = vmin.f32 %v286_v31, 6.0 }
  0xef   : > { %v288_v33 = vmul.f32 0.16666667, %v287_v32 }
  0xf1   : > { %291 = vperm.xlu1 %453, %v288_v33  }
 0x170   : > { %v292_v38 = vpop.permute.xlu1 %291 }
 0x171   : > { %v299_v39 = vrot.slane %v292_v38, %v298_v37 }
 0x173   : > { %v301_v40 = vmul.f32 %v299_v39, %v243_v1 }
 0x175   : > { %302 = vst [vmem:[%s242_s27] sm:$0xff] %v301_v40 }
 0x176   : > { %499 = shalt.err (!%p496_p4)
}
 0x177   : > { %s500_s12 = scalar_lea.hbm %s721_s10, 128  ;;  %s504_s17 = scalar_lea.hbm %s770_s5, 256 }
 0x178   : > { %p501_p5 = scmp.ne.s32.totalorder %s721_s10, %s500_s12  ;;  %p505_p0 = scmp.lt.u32.totalorder %s721_s10, %s770_s5 }
 0x179   : > { %p506_p1 = scmp.lt.u32.totalorder %s504_s17, %s500_s12  ;;  %p508_p6 = scmp.lt.u32.totalorder %s500_s12, %s721_s10 }
 0x17a   : > { %p502_p8 = pnand %p501_p5, %p779_p11 }
 0x17b   : > { %p507_p3 = por %p506_p1, %p505_p0 }
 0x17c   : > { %p503_p9 = pneg %p502_p8 }
 0x17d   : > { %p509_p12 = por %p508_p6, %p507_p3 }
 0x17f   : > { %p510_p13 = pnand %p509_p12, %p503_p9 }
 0x181   : > { %513 = shalt.err (!%p510_p13)
}
 0x182   : > { %407 = dma.vmem_to_hbm [thread:$0]  (%p779_p11), %s723_s29, 128, %s721_s10, %s304_s11  }
 0x183 PF: > { %s330_s24 = sand.u32 1, %s540_s20   ;;  %p780_p7 = scmp.ne.s32.totalorder %s775_s7, 0 }
 0x184   : > { %p781_p10 = scmp.ge.s32.totalorder %s552_s23, 2  ;;  %s331_s26 = scalar_lea.sflag [#allocation5], %s330_s24 }
 0x186   : > { %p414_p2 = pnand %p781_p10, %p780_p7 }
 0x188   : > { %535 = dma.done.wait (!%p414_p2), %s331_s26, 128  }
 0x189   : > { %537 = vsyncadd (!%p414_p2), %s331_s26, 4294967168  ;;  %p20_p4 = scmp.ge.s32.totalorder %s616_s25, 4   ;;  %s782_s20 = smov %s544_s21 }
 0x18a   : > { %s783_s21 = smov %s548_s22  ;;  %s784_s22 = smov %s628_s28 }
 0x18b   : > { %s785_s23 = smov %s616_s25  ;;  %22 = sbr.rel (!%p20_p4) target bundleno = 8 (0x8), region = 85 }
 0x192   :  { %336 = vsyncpa [#allocation4], 1 }
 0x193   :  { %338 = vsyncpa [#allocation4 + $0x1], 1 }
 0x194   :  { %339 = vsyncpa [#allocation5], 1 }
 0x195   :  { %341 = vsyncpa [#allocation5 + $0x1], 1 }

</bundles_post_ra>
